<compile_context>
chip_gen: v6e
topology: v6e:2x2x1
jax: 0.10.0
libtpu: 0.0.40
codegen_flags: <defaults>
</compile_context>

<pallas_src>
import functools

import jax
import jax.numpy as jnp
from jax.experimental import pallas as pl
from jax.experimental.pallas import tpu as pltpu

LANE = 128
SUBLANE = 8


def _round_up(n, m):
    return ((n + m - 1) // m) * m


def _ff_kernel(x_ref, w1_ref, wmid_ref, w5_ref, bhid_ref, bout_ref, out_ref,
               *, n_sub, sub_rows):
    """One batch tile of the fused 5-layer MLP.

    The tile is processed as `n_sub` independent sub-tiles whose layer chains are emitted
    interleaved, so MXU work for one sub-tile overlaps the VPU bias/ReLU epilogue of the
    other. Matmuls use bf16 operands with f32 accumulation; bias-add / ReLU stay in f32.
    """
    w1 = w1_ref[...]
    b1 = bhid_ref[0:1, :]
    hs = []
    for s in range(n_sub):
        xs = x_ref[pl.ds(s * sub_rows, sub_rows), :].astype(w1.dtype)  # f32 -> bf16 in-kernel
        hs.append(jnp.maximum(
            jnp.dot(xs, w1, preferred_element_type=jnp.float32) + b1, 0.0))

    # Hidden layers 2..4, statically unrolled; both sub-tiles per layer (independent chains).
    for j in range(3):
        wj = wmid_ref[j]
        bj = bhid_ref[j + 1:j + 2, :]
        hs = [jnp.maximum(
            jnp.dot(h.astype(wj.dtype), wj, preferred_element_type=jnp.float32) + bj, 0.0)
            for h in hs]

    # Output layer (no activation), bf16 writeback on a lane-dense 128-wide block.
    w5 = w5_ref[...]
    bo = bout_ref[0:1, :]
    for s in range(n_sub):
        o = jnp.dot(hs[s].astype(w5.dtype), w5, preferred_element_type=jnp.float32) + bo
        out_ref[pl.ds(s * sub_rows, sub_rows), :] = o.astype(out_ref.dtype)


def ff_network_forward(x, params, *, compute_dtype=jnp.bfloat16):
    """x: (batch, input_size) f32. params: list of 5 (W_t, b) with W_t shaped (in, out)."""
    batch, input_size = x.shape
    hidden_size = params[0][0].shape[1]
    output_size = params[-1][0].shape[1]

    h_p = _round_up(hidden_size, LANE)
    out_p = _round_up(output_size, LANE)

    # Batch tile: 256 for big batches (matches v6e/v7x 256-wide MXU, halves per-step overhead);
    # shrink if that would leave a single grid step (keep both v7x TCs busy); round tiny
    # batches to 16 for bf16 sublane packing.
    if batch >= 256:
        tb = 256
        if _round_up(batch, tb) // tb < 2:
            tb = 128
    elif batch >= 128:
        tb = 128
    else:
        tb = _round_up(batch, 16)
    b_p = _round_up(batch, tb)
    grid = (b_p // tb,)

    n_sub = 2 if tb >= 128 else 1           # sub-tile interleave (MRF overlap on v5e/v6e)
    sub_rows = tb // n_sub

    # x stays f32 and feature-unpadded (block last dim == full array dim); pad batch only
    # when needed.
    if b_p != batch:
        x_in = jnp.zeros((b_p, input_size), x.dtype).at[:batch].set(x)
    else:
        x_in = x

    def pad_w(w, rows, cols):
        return jnp.zeros((rows, cols), compute_dtype).at[:w.shape[0], :w.shape[1]].set(
            w.astype(compute_dtype))

    w1 = pad_w(params[0][0], input_size, h_p)                             # (IN, H_pad)
    wmid = jnp.stack([pad_w(params[i][0], h_p, h_p) for i in (1, 2, 3)])  # (3, H_pad, H_pad)
    w5 = pad_w(params[4][0], h_p, out_p)                                  # (H_pad, OUT_pad)

    bhid = jnp.zeros((SUBLANE, h_p), jnp.float32)                         # rows 0..3 = biases 1..4
    for i in range(4):
        bhid = bhid.at[i, :hidden_size].set(params[i][1].astype(jnp.float32))
    bout = jnp.zeros((SUBLANE, out_p), jnp.float32).at[0, :output_size].set(
        params[4][1].astype(jnp.float32))                                 # row 0 = output bias

    # --- chip-aware VMEM limit ---
    try:
        vmem_cap = int(pltpu.get_tpu_info().vmem_capacity_bytes)
    except Exception:
        vmem_cap = 128 * 1024 * 1024
    wraw = 2 * (w1.size + wmid.size + w5.size) + 4 * (bhid.size + bout.size)
    stream = 3 * (tb * input_size * 4 + tb * out_p * 2)   # pipelined x / out tiles
    act = 3 * tb * h_p * 4                                 # f32 activations + temporaries
    needed = 2 * wraw + stream + act                       # conservative (covers dbl-buffered fallback)
    vmem_limit = int(min(max(int(1.25 * needed), 16 * 1024 * 1024), int(0.75 * vmem_cap)))
    # TODO(synk): if resident bf16 weights ever exceed ~0.75*VMEM (very large hidden_size),
    # add a K/N tiling grid axis for the hidden x hidden layers instead of growing the limit.

    flops = 2 * b_p * (input_size * h_p + 3 * h_p * h_p + h_p * out_p)
    bytes_accessed = (x_in.size * x_in.dtype.itemsize
                      + 2 * (w1.size + wmid.size + w5.size)
                      + 4 * (bhid.size + bout.size)
                      + b_p * out_p * 2)

    kernel_fn = functools.partial(_ff_kernel, n_sub=n_sub, sub_rows=sub_rows)

    def build(use_buffered):
        def wspec(shape, imap):
            if use_buffered:
                return pl.BlockSpec(shape, imap, pipeline_mode=pl.Buffered(1))
            return pl.BlockSpec(shape, imap)

        return pl.pallas_call(
            kernel_fn,
            out_shape=jax.ShapeDtypeStruct((b_p, out_p), jnp.bfloat16),
            grid=grid,
            in_specs=[
                pl.BlockSpec((tb, input_size), lambda i: (i, 0)),   # x: pipelined, unpadded features
                wspec((input_size, h_p), lambda i: (0, 0)),         # w1: VMEM-resident
                wspec((3, h_p, h_p), lambda i: (0, 0, 0)),          # w2..w4 stacked: resident
                wspec((h_p, out_p), lambda i: (0, 0)),              # w5: resident
                wspec((SUBLANE, h_p), lambda i: (0, 0)),            # hidden biases (f32)
                wspec((SUBLANE, out_p), lambda i: (0, 0)),          # output bias (f32)
            ],
            out_specs=pl.BlockSpec((tb, out_p), lambda i: (i, 0)),
            compiler_params=pltpu.CompilerParams(
                dimension_semantics=("parallel",),
                vmem_limit_bytes=vmem_limit,
            ),
            cost_estimate=pl.CostEstimate(flops=flops, transcendentals=0,
                                          bytes_accessed=bytes_accessed),
        )

    try:
        out_padded = build(True)(x_in, w1, wmid, w5, bhid, bout)
    except Exception:
        # TODO(synk): pipeline_mode=pl.Buffered(1) rejected on this JAX build; fall back to
        # default double-buffering of the resident weights (correctness identical).
        out_padded = build(False)(x_in, w1, wmid, w5, bhid, bout)

    return out_padded[:batch, :output_size].astype(jnp.float32)


def init_params(key, input_size, hidden_size, output_size):
    """Deterministic init mimicking nn.Linear's uniform(-1/sqrt(fan_in), 1/sqrt(fan_in)).
    Weights are stored already transposed: (fan_in, fan_out)."""
    dims = [(input_size, hidden_size),
            (hidden_size, hidden_size),
            (hidden_size, hidden_size),
            (hidden_size, hidden_size),
            (hidden_size, output_size)]
    params = []
    for (fan_in, fan_out) in dims:
        key, kw, kb = jax.random.split(key, 3)
        bound = 1.0 / jnp.sqrt(jnp.float32(fan_in))
        w_t = jax.random.uniform(kw, (fan_in, fan_out), jnp.float32, -bound, bound)
        b = jax.random.uniform(kb, (fan_out,), jnp.float32, -bound, bound)
        params.append((w_t, b))
    return params


def ff_network_reference_f32(x, params):
    """Pure-JAX f32 reference (exact PyTorch semantics)."""
    h = x
    for i, (w, b) in enumerate(params):
        h = h @ w + b
        if i < len(params) - 1:
            h = jnp.maximum(h, 0.0)
    return h


def ff_network_reference_bf16(x, params):
    """Pure-JAX reference with the same bf16-operand / f32-accumulate / bf16-writeback
    casting as the kernel."""
    h = x.astype(jnp.bfloat16)
    for i, (w, b) in enumerate(params):
        h = jnp.dot(h, w.astype(jnp.bfloat16), preferred_element_type=jnp.float32) + b
        if i < len(params) - 1:
            h = jnp.maximum(h, 0.0).astype(jnp.bfloat16)
    return h.astype(jnp.bfloat16).astype(jnp.float32)


def _check_case(key, batch, input_size, hidden_size, output_size, params):
    kx = jax.random.fold_in(key, batch)
    x = jax.random.normal(kx, (batch, input_size), jnp.float32)

    out = jax.block_until_ready(ff_network_forward(x, params))
    assert out.shape == (batch, output_size)

    ref_bf16 = ff_network_reference_bf16(x, params)
    assert jnp.allclose(out, ref_bf16, atol=1e-2, rtol=1e-2), \
        f"Pallas output mismatch vs bf16 reference (batch={batch})"

    ref_f32 = ff_network_reference_f32(x, params)
    assert jnp.allclose(out, ref_f32, atol=1e-1), \
        f"Pallas output drifted too far from f32 reference (batch={batch})"


if __name__ == "__main__":
    input_size, hidden_size, output_size = 32, 64, 8

    key = jax.random.PRNGKey(0)
    key, kp = jax.random.split(key)
    params = init_params(kp, input_size, hidden_size, output_size)

    # Small batch: tiny-tile path (tb=16, single grid step, no sub-tile interleave).
    _check_case(key, 8, input_size, hidden_size, output_size, params)

    # Larger batch: tb=256, 2 grid steps, batch padding, 2-way sub-tile interleave.
    _check_case(key, 384, input_size, hidden_size, output_size, params)

    print("KERNEL_OK")
</pallas_src>

<mosaic_0001>
module attributes {stable_mosaic.version = 11 : i64} {
  func.func @_ff_kernel(%arg0: i32, %arg1: memref<16x32xf32, #tpu.memory_space<vmem>>, %arg2: memref<32x128xbf16, #tpu.memory_space<vmem>>, %arg3: memref<3x128x128xbf16, #tpu.memory_space<vmem>>, %arg4: memref<128x128xbf16, #tpu.memory_space<vmem>>, %arg5: memref<8x128xf32, #tpu.memory_space<vmem>>, %arg6: memref<8x128xf32, #tpu.memory_space<vmem>>, %arg7: memref<16x128xbf16, #tpu.memory_space<vmem>>) attributes {dimension_semantics = [#tpu.dimension_semantics<parallel>], iteration_bounds = array<i64: 1>, scalar_prefetch = 0 : i64, scratch_operands = 0 : i64, tpu.core_type = #tpu.core_type<tc>, window_params = [{transform_indices = @transform_0, window_bounds = array<i64: 16, 32>}, {pipeline_mode = #tpu.pipeline_mode<synchronous>, transform_indices = @transform_1, window_bounds = array<i64: 32, 128>}, {pipeline_mode = #tpu.pipeline_mode<synchronous>, transform_indices = @transform_2, window_bounds = array<i64: 3, 128, 128>}, {pipeline_mode = #tpu.pipeline_mode<synchronous>, transform_indices = @transform_3, window_bounds = array<i64: 128, 128>}, {pipeline_mode = #tpu.pipeline_mode<synchronous>, transform_indices = @transform_4, window_bounds = array<i64: 8, 128>}, {pipeline_mode = #tpu.pipeline_mode<synchronous>, transform_indices = @transform_5, window_bounds = array<i64: 8, 128>}, {transform_indices = @transform_6, window_bounds = array<i64: 16, 128>}]} {
    %c0 = arith.constant 0 : index
    %c0_0 = arith.constant 0 : index
    %0 = vector.load %arg2[%c0, %c0_0] : memref<32x128xbf16, #tpu.memory_space<vmem>>, vector<32x128xbf16>
    %c0_1 = arith.constant 0 : index
    %c0_2 = arith.constant 0 : index
    %1 = vector.load %arg5[%c0_1, %c0_2] : memref<8x128xf32, #tpu.memory_space<vmem>>, vector<1x128xf32>
    %c0_3 = arith.constant 0 : index
    %c0_4 = arith.constant 0 : index
    %2 = vector.load %arg1[%c0_3, %c0_4] : memref<16x32xf32, #tpu.memory_space<vmem>>, vector<16x32xf32>
    %3 = arith.truncf %2 : vector<16x32xf32> to vector<16x32xbf16>
    %cst = arith.constant dense<0.000000e+00> : vector<16x128xf32>
    %4 = tpu.matmul %3, %0, %cst {dimension_numbers = #tpu.dot_dimension_numbers<[1], [0], [0], [1], [0, 0, 1, 1], [], []>} : vector<16x32xbf16>, vector<32x128xbf16>, vector<16x128xf32> -> vector<16x128xf32>
    %5 = vector.broadcast %1 : vector<1x128xf32> to vector<16x128xf32>
    %6 = arith.addf %4, %5 : vector<16x128xf32>
    %cst_5 = arith.constant 0.000000e+00 : f32
    %7 = vector.broadcast %cst_5 : f32 to vector<16x128xf32>
    %8 = arith.maximumf %6, %7 : vector<16x128xf32>
    %c0_6 = arith.constant 0 : index
    %c0_7 = arith.constant 0 : index
    %c0_8 = arith.constant 0 : index
    %9 = vector.load %arg3[%c0_6, %c0_7, %c0_8] : memref<3x128x128xbf16, #tpu.memory_space<vmem>>, vector<1x128x128xbf16>
    %10 = vector.shape_cast %9 : vector<1x128x128xbf16> to vector<128x128xbf16>
    %c1 = arith.constant 1 : index
    %c0_9 = arith.constant 0 : index
    %11 = vector.load %arg5[%c1, %c0_9] : memref<8x128xf32, #tpu.memory_space<vmem>>, vector<1x128xf32>
    %12 = arith.truncf %8 : vector<16x128xf32> to vector<16x128xbf16>
    %cst_10 = arith.constant dense<0.000000e+00> : vector<16x128xf32>
    %13 = tpu.matmul %12, %10, %cst_10 {dimension_numbers = #tpu.dot_dimension_numbers<[1], [0], [0], [1], [0, 0, 1, 1], [], []>} : vector<16x128xbf16>, vector<128x128xbf16>, vector<16x128xf32> -> vector<16x128xf32>
    %14 = vector.broadcast %11 : vector<1x128xf32> to vector<16x128xf32>
    %15 = arith.addf %13, %14 : vector<16x128xf32>
    %cst_11 = arith.constant 0.000000e+00 : f32
    %16 = vector.broadcast %cst_11 : f32 to vector<16x128xf32>
    %17 = arith.maximumf %15, %16 : vector<16x128xf32>
    %c1_12 = arith.constant 1 : index
    %c0_13 = arith.constant 0 : index
    %c0_14 = arith.constant 0 : index
    %18 = vector.load %arg3[%c1_12, %c0_13, %c0_14] : memref<3x128x128xbf16, #tpu.memory_space<vmem>>, vector<1x128x128xbf16>
    %19 = vector.shape_cast %18 : vector<1x128x128xbf16> to vector<128x128xbf16>
    %c2 = arith.constant 2 : index
    %c0_15 = arith.constant 0 : index
    %20 = vector.load %arg5[%c2, %c0_15] : memref<8x128xf32, #tpu.memory_space<vmem>>, vector<1x128xf32>
    %21 = arith.truncf %17 : vector<16x128xf32> to vector<16x128xbf16>
    %cst_16 = arith.constant dense<0.000000e+00> : vector<16x128xf32>
    %22 = tpu.matmul %21, %19, %cst_16 {dimension_numbers = #tpu.dot_dimension_numbers<[1], [0], [0], [1], [0, 0, 1, 1], [], []>} : vector<16x128xbf16>, vector<128x128xbf16>, vector<16x128xf32> -> vector<16x128xf32>
    %23 = vector.broadcast %20 : vector<1x128xf32> to vector<16x128xf32>
    %24 = arith.addf %22, %23 : vector<16x128xf32>
    %cst_17 = arith.constant 0.000000e+00 : f32
    %25 = vector.broadcast %cst_17 : f32 to vector<16x128xf32>
    %26 = arith.maximumf %24, %25 : vector<16x128xf32>
    %c2_18 = arith.constant 2 : index
    %c0_19 = arith.constant 0 : index
    %c0_20 = arith.constant 0 : index
    %27 = vector.load %arg3[%c2_18, %c0_19, %c0_20] : memref<3x128x128xbf16, #tpu.memory_space<vmem>>, vector<1x128x128xbf16>
    %28 = vector.shape_cast %27 : vector<1x128x128xbf16> to vector<128x128xbf16>
    %c3 = arith.constant 3 : index
    %c0_21 = arith.constant 0 : index
    %29 = vector.load %arg5[%c3, %c0_21] : memref<8x128xf32, #tpu.memory_space<vmem>>, vector<1x128xf32>
    %30 = arith.truncf %26 : vector<16x128xf32> to vector<16x128xbf16>
    %cst_22 = arith.constant dense<0.000000e+00> : vector<16x128xf32>
    %31 = tpu.matmul %30, %28, %cst_22 {dimension_numbers = #tpu.dot_dimension_numbers<[1], [0], [0], [1], [0, 0, 1, 1], [], []>} : vector<16x128xbf16>, vector<128x128xbf16>, vector<16x128xf32> -> vector<16x128xf32>
    %32 = vector.broadcast %29 : vector<1x128xf32> to vector<16x128xf32>
    %33 = arith.addf %31, %32 : vector<16x128xf32>
    %cst_23 = arith.constant 0.000000e+00 : f32
    %34 = vector.broadcast %cst_23 : f32 to vector<16x128xf32>
    %35 = arith.maximumf %33, %34 : vector<16x128xf32>
    %c0_24 = arith.constant 0 : index
    %c0_25 = arith.constant 0 : index
    %36 = vector.load %arg4[%c0_24, %c0_25] : memref<128x128xbf16, #tpu.memory_space<vmem>>, vector<128x128xbf16>
    %c0_26 = arith.constant 0 : index
    %c0_27 = arith.constant 0 : index
    %37 = vector.load %arg6[%c0_26, %c0_27] : memref<8x128xf32, #tpu.memory_space<vmem>>, vector<1x128xf32>
    %38 = arith.truncf %35 : vector<16x128xf32> to vector<16x128xbf16>
    %cst_28 = arith.constant dense<0.000000e+00> : vector<16x128xf32>
    %39 = tpu.matmul %38, %36, %cst_28 {dimension_numbers = #tpu.dot_dimension_numbers<[1], [0], [0], [1], [0, 0, 1, 1], [], []>} : vector<16x128xbf16>, vector<128x128xbf16>, vector<16x128xf32> -> vector<16x128xf32>
    %40 = vector.broadcast %37 : vector<1x128xf32> to vector<16x128xf32>
    %41 = arith.addf %39, %40 : vector<16x128xf32>
    %42 = arith.truncf %41 : vector<16x128xf32> to vector<16x128xbf16>
    %c0_29 = arith.constant 0 : index
    %c0_30 = arith.constant 0 : index
    %43 = vector.load %arg7[%c0_29, %c0_30] : memref<16x128xbf16, #tpu.memory_space<vmem>>, vector<16x128xbf16>
    tpu.vector_store %arg7[%c0_29, %c0_30], %42 {strides = array<i32>} : memref<16x128xbf16, #tpu.memory_space<vmem>>, vector<16x128xbf16>,
    return
  }
  func.func @transform_0(%arg0: i32) -> (i32, i32) {
    %c0_i32 = arith.constant 0 : i32
    %c0_i32_0 = arith.constant 0 : i32
    return %arg0, %c0_i32 : i32, i32
  }
  func.func @transform_1(%arg0: i32) -> (i32, i32) {
    %c0_i32 = arith.constant 0 : i32
    %c0_i32_0 = arith.constant 0 : i32
    %c0_i32_1 = arith.constant 0 : i32
    return %c0_i32, %c0_i32_0 : i32, i32
  }
  func.func @transform_2(%arg0: i32) -> (i32, i32, i32) {
    %c0_i32 = arith.constant 0 : i32
    %c0_i32_0 = arith.constant 0 : i32
    %c0_i32_1 = arith.constant 0 : i32
    %c0_i32_2 = arith.constant 0 : i32
    return %c0_i32, %c0_i32_0, %c0_i32_1 : i32, i32, i32
  }
  func.func @transform_3(%arg0: i32) -> (i32, i32) {
    %c0_i32 = arith.constant 0 : i32
    %c0_i32_0 = arith.constant 0 : i32
    %c0_i32_1 = arith.constant 0 : i32
    return %c0_i32, %c0_i32_0 : i32, i32
  }
  func.func @transform_4(%arg0: i32) -> (i32, i32) {
    %c0_i32 = arith.constant 0 : i32
    %c0_i32_0 = arith.constant 0 : i32
    %c0_i32_1 = arith.constant 0 : i32
    return %c0_i32, %c0_i32_0 : i32, i32
  }
  func.func @transform_5(%arg0: i32) -> (i32, i32) {
    %c0_i32 = arith.constant 0 : i32
    %c0_i32_0 = arith.constant 0 : i32
    %c0_i32_1 = arith.constant 0 : i32
    return %c0_i32, %c0_i32_0 : i32, i32
  }
  func.func @transform_6(%arg0: i32) -> (i32, i32) {
    %c0_i32 = arith.constant 0 : i32
    %c0_i32_0 = arith.constant 0 : i32
    return %arg0, %c0_i32 : i32, i32
  }
}

module attributes {stable_mosaic.version = 11 : i64} {
  func.func @_ff_kernel(%arg0: i32, %arg1: memref<16x32xf32, #tpu.memory_space<vmem>>, %arg2: memref<32x128xbf16, #tpu.memory_space<vmem>>, %arg3: memref<3x128x128xbf16, #tpu.memory_space<vmem>>, %arg4: memref<128x128xbf16, #tpu.memory_space<vmem>>, %arg5: memref<8x128xf32, #tpu.memory_space<vmem>>, %arg6: memref<8x128xf32, #tpu.memory_space<vmem>>, %arg7: memref<16x128xbf16, #tpu.memory_space<vmem>>) attributes {dimension_semantics = [#tpu.dimension_semantics<parallel>], iteration_bounds = array<i64: 1>, scalar_prefetch = 0 : i64, scratch_operands = 0 : i64, tpu.core_type = #tpu.core_type<tc>, window_params = [{transform_indices = @transform_0, window_bounds = array<i64: 16, 32>}, {pipeline_mode = #tpu.pipeline_mode<synchronous>, transform_indices = @transform_1, window_bounds = array<i64: 32, 128>}, {pipeline_mode = #tpu.pipeline_mode<synchronous>, transform_indices = @transform_2, window_bounds = array<i64: 3, 128, 128>}, {pipeline_mode = #tpu.pipeline_mode<synchronous>, transform_indices = @transform_3, window_bounds = array<i64: 128, 128>}, {pipeline_mode = #tpu.pipeline_mode<synchronous>, transform_indices = @transform_4, window_bounds = array<i64: 8, 128>}, {pipeline_mode = #tpu.pipeline_mode<synchronous>, transform_indices = @transform_5, window_bounds = array<i64: 8, 128>}, {transform_indices = @transform_6, window_bounds = array<i64: 16, 128>}]} {
    %c0 = arith.constant 0 : index
    %c0_0 = arith.constant 0 : index
    %0 = vector.load %arg2[%c0, %c0_0] : memref<32x128xbf16, #tpu.memory_space<vmem>>, vector<32x128xbf16>
    %c0_1 = arith.constant 0 : index
    %c0_2 = arith.constant 0 : index
    %1 = vector.load %arg5[%c0_1, %c0_2] : memref<8x128xf32, #tpu.memory_space<vmem>>, vector<1x128xf32>
    %c0_3 = arith.constant 0 : index
    %c0_4 = arith.constant 0 : index
    %2 = vector.load %arg1[%c0_3, %c0_4] : memref<16x32xf32, #tpu.memory_space<vmem>>, vector<16x32xf32>
    %3 = arith.truncf %2 : vector<16x32xf32> to vector<16x32xbf16>
    %cst = arith.constant dense<0.000000e+00> : vector<16x128xf32>
    %4 = tpu.matmul %3, %0, %cst {dimension_numbers = #tpu.dot_dimension_numbers<[1], [0], [0], [1], [0, 0, 1, 1], [], []>} : vector<16x32xbf16>, vector<32x128xbf16>, vector<16x128xf32> -> vector<16x128xf32>
    %5 = vector.broadcast %1 : vector<1x128xf32> to vector<16x128xf32>
    %6 = arith.addf %4, %5 : vector<16x128xf32>
    %cst_5 = arith.constant 0.000000e+00 : f32
    %7 = vector.broadcast %cst_5 : f32 to vector<16x128xf32>
    %8 = arith.maximumf %6, %7 : vector<16x128xf32>
    %c0_6 = arith.constant 0 : index
    %c0_7 = arith.constant 0 : index
    %c0_8 = arith.constant 0 : index
    %9 = vector.load %arg3[%c0_6, %c0_7, %c0_8] : memref<3x128x128xbf16, #tpu.memory_space<vmem>>, vector<1x128x128xbf16>
    %10 = vector.shape_cast %9 : vector<1x128x128xbf16> to vector<128x128xbf16>
    %c1 = arith.constant 1 : index
    %c0_9 = arith.constant 0 : index
    %11 = vector.load %arg5[%c1, %c0_9] : memref<8x128xf32, #tpu.memory_space<vmem>>, vector<1x128xf32>
    %12 = arith.truncf %8 : vector<16x128xf32> to vector<16x128xbf16>
    %cst_10 = arith.constant dense<0.000000e+00> : vector<16x128xf32>
    %13 = tpu.matmul %12, %10, %cst_10 {dimension_numbers = #tpu.dot_dimension_numbers<[1], [0], [0], [1], [0, 0, 1, 1], [], []>} : vector<16x128xbf16>, vector<128x128xbf16>, vector<16x128xf32> -> vector<16x128xf32>
    %14 = vector.broadcast %11 : vector<1x128xf32> to vector<16x128xf32>
    %15 = arith.addf %13, %14 : vector<16x128xf32>
    %cst_11 = arith.constant 0.000000e+00 : f32
    %16 = vector.broadcast %cst_11 : f32 to vector<16x128xf32>
    %17 = arith.maximumf %15, %16 : vector<16x128xf32>
    %c1_12 = arith.constant 1 : index
    %c0_13 = arith.constant 0 : index
    %c0_14 = arith.constant 0 : index
    %18 = vector.load %arg3[%c1_12, %c0_13, %c0_14] : memref<3x128x128xbf16, #tpu.memory_space<vmem>>, vector<1x128x128xbf16>
    %19 = vector.shape_cast %18 : vector<1x128x128xbf16> to vector<128x128xbf16>
    %c2 = arith.constant 2 : index
    %c0_15 = arith.constant 0 : index
    %20 = vector.load %arg5[%c2, %c0_15] : memref<8x128xf32, #tpu.memory_space<vmem>>, vector<1x128xf32>
    %21 = arith.truncf %17 : vector<16x128xf32> to vector<16x128xbf16>
    %cst_16 = arith.constant dense<0.000000e+00> : vector<16x128xf32>
    %22 = tpu.matmul %21, %19, %cst_16 {dimension_numbers = #tpu.dot_dimension_numbers<[1], [0], [0], [1], [0, 0, 1, 1], [], []>} : vector<16x128xbf16>, vector<128x128xbf16>, vector<16x128xf32> -> vector<16x128xf32>
    %23 = vector.broadcast %20 : vector<1x128xf32> to vector<16x128xf32>
    %24 = arith.addf %22, %23 : vector<16x128xf32>
    %cst_17 = arith.constant 0.000000e+00 : f32
    %25 = vector.broadcast %cst_17 : f32 to vector<16x128xf32>
    %26 = arith.maximumf %24, %25 : vector<16x128xf32>
    %c2_18 = arith.constant 2 : index
    %c0_19 = arith.constant 0 : index
    %c0_20 = arith.constant 0 : index
    %27 = vector.load %arg3[%c2_18, %c0_19, %c0_20] : memref<3x128x128xbf16, #tpu.memory_space<vmem>>, vector<1x128x128xbf16>
    %28 = vector.shape_cast %27 : vector<1x128x128xbf16> to vector<128x128xbf16>
    %c3 = arith.constant 3 : index
    %c0_21 = arith.constant 0 : index
    %29 = vector.load %arg5[%c3, %c0_21] : memref<8x128xf32, #tpu.memory_space<vmem>>, vector<1x128xf32>
    %30 = arith.truncf %26 : vector<16x128xf32> to vector<16x128xbf16>
    %cst_22 = arith.constant dense<0.000000e+00> : vector<16x128xf32>
    %31 = tpu.matmul %30, %28, %cst_22 {dimension_numbers = #tpu.dot_dimension_numbers<[1], [0], [0], [1], [0, 0, 1, 1], [], []>} : vector<16x128xbf16>, vector<128x128xbf16>, vector<16x128xf32> -> vector<16x128xf32>
    %32 = vector.broadcast %29 : vector<1x128xf32> to vector<16x128xf32>
    %33 = arith.addf %31, %32 : vector<16x128xf32>
    %cst_23 = arith.constant 0.000000e+00 : f32
    %34 = vector.broadcast %cst_23 : f32 to vector<16x128xf32>
    %35 = arith.maximumf %33, %34 : vector<16x128xf32>
    %c0_24 = arith.constant 0 : index
    %c0_25 = arith.constant 0 : index
    %36 = vector.load %arg4[%c0_24, %c0_25] : memref<128x128xbf16, #tpu.memory_space<vmem>>, vector<128x128xbf16>
    %c0_26 = arith.constant 0 : index
    %c0_27 = arith.constant 0 : index
    %37 = vector.load %arg6[%c0_26, %c0_27] : memref<8x128xf32, #tpu.memory_space<vmem>>, vector<1x128xf32>
    %38 = arith.truncf %35 : vector<16x128xf32> to vector<16x128xbf16>
    %cst_28 = arith.constant dense<0.000000e+00> : vector<16x128xf32>
    %39 = tpu.matmul %38, %36, %cst_28 {dimension_numbers = #tpu.dot_dimension_numbers<[1], [0], [0], [1], [0, 0, 1, 1], [], []>} : vector<16x128xbf16>, vector<128x128xbf16>, vector<16x128xf32> -> vector<16x128xf32>
    %40 = vector.broadcast %37 : vector<1x128xf32> to vector<16x128xf32>
    %41 = arith.addf %39, %40 : vector<16x128xf32>
    %42 = arith.truncf %41 : vector<16x128xf32> to vector<16x128xbf16>
    %c0_29 = arith.constant 0 : index
    %c0_30 = arith.constant 0 : index
    %43 = vector.load %arg7[%c0_29, %c0_30] : memref<16x128xbf16, #tpu.memory_space<vmem>>, vector<16x128xbf16>
    tpu.vector_store %arg7[%c0_29, %c0_30], %42 {strides = array<i32>} : memref<16x128xbf16, #tpu.memory_space<vmem>>, vector<16x128xbf16>,
    return
  }
  func.func @transform_0(%arg0: i32) -> (i32, i32) {
    %c0_i32 = arith.constant 0 : i32
    %c0_i32_0 = arith.constant 0 : i32
    return %arg0, %c0_i32 : i32, i32
  }
  func.func @transform_1(%arg0: i32) -> (i32, i32) {
    %c0_i32 = arith.constant 0 : i32
    %c0_i32_0 = arith.constant 0 : i32
    %c0_i32_1 = arith.constant 0 : i32
    return %c0_i32, %c0_i32_0 : i32, i32
  }
  func.func @transform_2(%arg0: i32) -> (i32, i32, i32) {
    %c0_i32 = arith.constant 0 : i32
    %c0_i32_0 = arith.constant 0 : i32
    %c0_i32_1 = arith.constant 0 : i32
    %c0_i32_2 = arith.constant 0 : i32
    return %c0_i32, %c0_i32_0, %c0_i32_1 : i32, i32, i32
  }
  func.func @transform_3(%arg0: i32) -> (i32, i32) {
    %c0_i32 = arith.constant 0 : i32
    %c0_i32_0 = arith.constant 0 : i32
    %c0_i32_1 = arith.constant 0 : i32
    return %c0_i32, %c0_i32_0 : i32, i32
  }
  func.func @transform_4(%arg0: i32) -> (i32, i32) {
    %c0_i32 = arith.constant 0 : i32
    %c0_i32_0 = arith.constant 0 : i32
    %c0_i32_1 = arith.constant 0 : i32
    return %c0_i32, %c0_i32_0 : i32, i32
  }
  func.func @transform_5(%arg0: i32) -> (i32, i32) {
    %c0_i32 = arith.constant 0 : i32
    %c0_i32_0 = arith.constant 0 : i32
    %c0_i32_1 = arith.constant 0 : i32
    return %c0_i32, %c0_i32_0 : i32, i32
  }
  func.func @transform_6(%arg0: i32) -> (i32, i32) {
    %c0_i32 = arith.constant 0 : i32
    %c0_i32_0 = arith.constant 0 : i32
    return %arg0, %c0_i32 : i32, i32
  }
}

</mosaic_0001>

<bundles_post_ra>
// kernel: tpu_custom_call.1
= control target key start
LH: loop header
LB: loop body
LE: loop exit
PB: predicated region body
PF: predicated region fallthrough
CT: control target
= control target key end

     0   :  { %11 = vsyncpa [#allocation3], 0  ;;  %s1117_s0 = inlined_call_operand.hbm [shape: f32[16,32], index: 0, kind: input, shape index: {}]   ;;  %s1118_s1 = inlined_call_operand.hbm [shape: bf16[32,128], index: 1, kind: input, shape index: {}]   ;;  %s1119_s2 = inlined_call_operand.hbm [shape: bf16[3,128,128], index: 2, kind: input, shape index: {}]   ;;  %s1120_s3 = inlined_call_operand.hbm [shape: bf16[128,128], index: 3, kind: input, shape index: {}]   ;;  %s1121_s4 = inlined_call_operand.hbm [shape: f32[8,128], index: 4, kind: input, shape index: {}]   ;;  %s1122_s5 = inlined_call_operand.vmem [shape: f32[8,128], index: 5, kind: input, shape index: {}]   ;;  %s1123_s6 = inlined_call_operand.hbm [shape: bf16[16,128], index: 6, kind: output, shape index: {}]  }
   0x1   :  { %12 = vsyncpa [#allocation6], 0 }
   0x2   :  { %13 = vsyncpa [#allocation9], 0 }
   0x3   :  { %14 = vsyncpa [#allocation4], 0  ;;  %s993_s21 = smov [#allocation5]  }
   0x4   :  { %s32_s22 = sshll.u32 %s993_s21, 4  ;;  %s33_s22 = int_to_ptr.vmem [resolvable:$true] %s32_s22 }
   0x5   :  { %s873_s23 = scalar_lea.vmem %s33_s22, 256  ;;  %p878_p1 = scmp.lt.s32.totalorder %s33_s22, %s33_s22 }
   0x6   :  { %p874_p0 = scmp.ne.s32.totalorder %s33_s22, %s873_s23  ;;  %p879_p2 = scmp.lt.s32.totalorder %s873_s23, %s873_s23 }
   0x8   :  { %p880_p3 = por %p879_p2, %p878_p1 }
   0xa   :  { %p881_p4 = pnand %p880_p3, %p874_p0 }
   0xc   :  { %884 = shalt.err (!%p881_p4)
}
   0xd   :  { %s994_s24 = smov 64   ;;  %s995_s25 = smov 4  }
   0xe   :  { %38 = dma.hbm_to_vmem [thread:$0]  %s1118_s1, 256, %s33_s22, [#allocation6], %s994_s24, %s994_s24, %s995_s25  }
   0xf   :  { %s996_s28 = smov [#allocation8]   ;;  %s997_s30 = smov [#allocation2]  }
  0x10   :  { %s56_s29 = sshll.u32 %s996_s28, 4  ;;  %s20_s7 = sshll.u32 %s997_s30, 4  ;;  %s57_s29 = int_to_ptr.vmem [resolvable:$true] %s56_s29  ;;  %s21_s7 = int_to_ptr.vmem [resolvable:$true] %s20_s7 }
  0x11   :  { %s893_s8 = scalar_lea.vmem %s57_s29, 1024  ;;  %p898_p6 = scmp.lt.s32.totalorder %s57_s29, %s57_s29 }
  0x12   :  { %p894_p5 = scmp.ne.s32.totalorder %s57_s29, %s893_s8  ;;  %p899_p7 = scmp.lt.s32.totalorder %s893_s8, %s893_s8 }
  0x14   :  { %p900_p8 = por %p899_p7, %p898_p6 }
  0x16   :  { %p901_p9 = pnand %p900_p8, %p894_p5 }
  0x18   :  { %904 = shalt.err (!%p901_p9)
}
  0x19   :  { %62 = dma.hbm_to_vmem [thread:$0]  %s1120_s3, 1024, %s57_s29, [#allocation9], %s994_s24, %s994_s24, %s995_s25  }
  0x1a   :  { %s913_s1 = scalar_lea.vmem %s21_s7, 256  ;;  %p918_p11 = scmp.lt.s32.totalorder %s21_s7, %s21_s7 }
  0x1b   :  { %p914_p10 = scmp.ne.s32.totalorder %s21_s7, %s913_s1  ;;  %p919_p12 = scmp.lt.s32.totalorder %s913_s1, %s913_s1 }
  0x1d   :  { %p920_p13 = por %p919_p12, %p918_p11 }
  0x1f   :  { %p921_p0 = pnand %p920_p13, %p914_p10 }
  0x21   :  { %924 = shalt.err (!%p921_p0)
}
  0x22   :  { %s998_s11 = smov 128   ;;  %s999_s12 = smov 8  }
  0x23   :  { %26 = dma.hbm_to_vmem [thread:$0]  %s1117_s0, 256, %s21_s7, [#allocation3], %s998_s11, %s998_s11, %s999_s12  }
  0x24   :  { %s1000_s15 = smov [#allocation7]   ;;  %s1001_s17 = smov [#allocation10]  }
  0x25   :  { %s44_s16 = sshll.u32 %s1000_s15, 4  ;;  %s69_s18 = sshll.u32 %s1001_s17, 4  ;;  %s45_s16 = int_to_ptr.vmem [resolvable:$true] %s44_s16  ;;  %s70_s18 = int_to_ptr.vmem [resolvable:$true] %s69_s18 }
  0x26   :  { %s933_s3 = scalar_lea.vmem %s45_s16, 3072  ;;  %p938_p2 = scmp.lt.s32.totalorder %s45_s16, %s45_s16 }
  0x27   :  { %p934_p1 = scmp.ne.s32.totalorder %s45_s16, %s933_s3  ;;  %p939_p3 = scmp.lt.s32.totalorder %s933_s3, %s933_s3 }
  0x29   :  { %p940_p4 = por %p939_p3, %p938_p2 }
  0x2b   :  { %p941_p5 = pnand %p940_p4, %p934_p1 }
  0x2d   :  { %944 = shalt.err (!%p941_p5)
}
  0x2e   :  { %50 = dma.hbm_to_vmem [thread:$0]  %s1119_s2, 3072, %s45_s16, [#allocation6], %s994_s24, %s994_s24, %s995_s25  }
  0x2f   :  { %s953_s0 = scalar_lea.vmem %s70_s18, 128  ;;  %p958_p7 = scmp.lt.s32.totalorder %s70_s18, %s70_s18 }
  0x30   :  { %p954_p6 = scmp.ne.s32.totalorder %s70_s18, %s953_s0  ;;  %p959_p8 = scmp.lt.s32.totalorder %s953_s0, %s953_s0 }
  0x32   :  { %p960_p9 = por %p959_p8, %p958_p7 }
  0x34   :  { %p961_p10 = pnand %p960_p9, %p954_p6 }
  0x36   :  { %964 = shalt.err (!%p961_p10)
}
  0x37   :  { %72 = dma.hbm_to_vmem [thread:$0]  %s1121_s4, 128, %s70_s18, [#allocation9]  }
  0x38   :  { %985 = dma.done.wait [#allocation3], 256  }
  0x39   :  { %986 = vsyncadd [#allocation3], 4294967040 }
  0x3a   :  { %987 = dma.done.wait [#allocation6], 3328  }
  0x3b   :  { %988 = vsyncadd [#allocation6], 4294963968 }
  0x3c   :  { %989 = dma.done.wait [#allocation9], 1152  }
  0x3d   :  { %990 = vsyncadd [#allocation9], 4294966144  ;;  %v1002_v0 = vmov 0.0   ;;  %vm1003_vm0 = vmmov 0   ;;  %v831_v1 = vld [vmem:[#allocation5 + $0x8] sm:$0xff]   ;;  %v832_v2 = vld [vmem:[#allocation5] sm:$0xff]  }
  0x3e   :  { %731 = vmatprep.subr.bf16.mxu0 %v1002_v0  ;;  %735 = vmatprep.mubr.msk.bf16.mxu0 %vm1003_vm0, %v1002_v0  ;;  %v96_v3 = vld [vmem:[#allocation2] sm:$0xff]  ;;  %v97_v4 = vld [vmem:[#allocation2 + $0x8] sm:$0xff]  ;;  %v833_v5 = vld [vmem:[#allocation7 + $0x38] sm:$0xff]   ;;  %vm115_vm1 = vcmask 261120   ;;  %s1004_s23 = smov [#allocation11]  }
  0x3f   :  { %739 = vmatprep.subr.bf16.mxu1 %v1002_v0  ;;  %755 = vmatprep.mubr.msk.bf16.mxu1 %vm1003_vm0, %v1002_v0  ;;  %v98_v6 = vpack.c.bf16 %v97_v4, %v96_v3  ;;  %v834_v7 = vld [vmem:[#allocation7 + $0x30] sm:$0xff]   ;;  %v835_v8 = vld [vmem:[#allocation7 + $0x28] sm:$0xff]   ;;  %v836_v9 = vld [vmem:[#allocation7 + $0x20] sm:$0xff]   ;;  %s629_s26 = sshll.u32 %s1004_s23, 4  ;;  %s630_s26 = int_to_ptr.vmem [resolvable:$true] %s629_s26 }
  0x40   :  { %732 = vmatpush3.bf16.msra.mxu0 %v831_v1  ;;  %740 = vmatpush3.bf16.msra.mxu1 %v833_v5  ;;  %v837_v10 = vld [vmem:[#allocation7 + $0x18] sm:$0xff]   ;;  %v838_v11 = vld [vmem:[#allocation7 + $0x10] sm:$0xff]   ;;  %v839_v12 = vld [vmem:[#allocation7 + $0x8] sm:$0xff]   ;;  %s965_s27 = scalar_lea.vmem %s630_s26, 128  ;;  %p970_p12 = scmp.lt.s32.totalorder %s630_s26, %s630_s26 }
  0x41   :  { %733 = vmatprep.subr.bf16.mxu0 %v1002_v0  ;;  %741 = vmatprep.subr.bf16.mxu1 %v1002_v0  ;;  %v840_v13 = vld [vmem:[#allocation7] sm:$0xff]   ;;  %v841_v14 = vld [vmem:[#allocation7 + $0x78] sm:$0xff]   ;;  %v842_v15 = vld [vmem:[#allocation7 + $0x70] sm:$0xff]   ;;  %p966_p11 = scmp.ne.s32.totalorder %s630_s26, %s965_s27  ;;  %p971_p13 = scmp.lt.s32.totalorder %s965_s27, %s965_s27 }
  0x42   :  { %v843_v16 = vld [vmem:[#allocation7 + $0x68] sm:$0xff]   ;;  %v844_v17 = vld [vmem:[#allocation7 + $0x60] sm:$0xff]   ;;  %v845_v18 = vld [vmem:[#allocation7 + $0x58] sm:$0xff]  }
  0x43   :  { %v643_v19 = vld [vmem:[#allocation10] ss:$0 sm:$0xff]  ;;  %v846_v29 = vld [vmem:[#allocation7 + $0x50] sm:$0xff]   ;;  %v847_v30 = vld [vmem:[#allocation7 + $0x48] sm:$0xff]   ;;  %p972_p0 = por %p971_p13, %p970_p12 }
  0x44   :  { %734 = vmatpush3.bf16.msra.mxu0 %v832_v2  ;;  %742 = vmatpush3.bf16.msra.mxu1 %v834_v7  ;;  %v848_v31 = vld [vmem:[#allocation7 + $0x40] sm:$0xff]   ;;  %v849_v32 = vld [vmem:[#allocation7 + $0xb8] sm:$0xff]   ;;  %v850_v33 = vld [vmem:[#allocation7 + $0xb0] sm:$0xff]  }
  0x45   :  { %759 = vmatprep.subr.bf16.mxu0 %v1002_v0  ;;  %743 = vmatprep.subr.bf16.mxu1 %v1002_v0  ;;  %v851_v34 = vld [vmem:[#allocation7 + $0xa8] sm:$0xff]   ;;  %v852_v35 = vld [vmem:[#allocation7 + $0xa0] sm:$0xff]   ;;  %v853_v36 = vld [vmem:[#allocation7 + $0x98] sm:$0xff]   ;;  %p973_p1 = pnand %p972_p0, %p966_p11 }
  0x46   :  { %v647_v37 = vld [vmem:[#allocation10 + $0x1] ss:$0 sm:$0xff]  ;;  %v854_v47 = vld [vmem:[#allocation7 + $0x90] sm:$0xff]   ;;  %v855_v48 = vld [vmem:[#allocation7 + $0x88] sm:$0xff]  }
  0x47   :  { %736 = vmatmul.mubr.msk.bf16.vlgmr.msra.gmra.mxu0 %vm115_vm1, %v98_v6  ;;  %v856_v49 = vld [vmem:[#allocation7 + $0x80] sm:$0xff]   ;;  %v857_v50 = vld [vmem:[#allocation8 + $0x38] sm:$0xff]   ;;  %v858_v51 = vld [vmem:[#allocation8 + $0x30] sm:$0xff]  }
  0x48   :  { %775 = vmatprep.mubr.msk.bf16.mxu0 %vm1003_vm0, %v1002_v0  ;;  %744 = vmatpush3.bf16.msra.mxu1 %v835_v8  ;;  %v859_v52 = vld [vmem:[#allocation8 + $0x28] sm:$0xff]   ;;  %v860_v53 = vld [vmem:[#allocation8 + $0x20] sm:$0xff]   ;;  %v861_v54 = vld [vmem:[#allocation8 + $0x18] sm:$0xff]  }
  0x49   :  { %745 = vmatprep.subr.bf16.mxu1 %v1002_v0  ;;  %760 = vmatpush3.bf16.msra.mxu0 %v841_v14  ;;  %v656_v55 = vld [vmem:[#allocation10 + $0x2] ss:$0 sm:$0xff]  ;;  %v862_v2 = vld [vmem:[#allocation8 + $0x10] sm:$0xff]   ;;  %v863_v3 = vld [vmem:[#allocation8 + $0x8] sm:$0xff]  }
  0x4a   :  { %761 = vmatprep.subr.bf16.mxu0 %v1002_v0  ;;  %v864_v4 = vld [vmem:[#allocation8] sm:$0xff]  }
  0x4b   :  { %v665_v5 = vld [vmem:[#allocation10 + $0x3] ss:$0 sm:$0xff] }
  0x4c   :  { %746 = vmatpush3.bf16.msra.mxu1 %v836_v9 }
  0x4d   :  { %747 = vmatprep.subr.bf16.mxu1 %v1002_v0  ;;  %762 = vmatpush3.bf16.msra.mxu0 %v842_v15 }
  0x4e   :  { %763 = vmatprep.subr.bf16.mxu0 %v1002_v0 }
  0x50   :  { %748 = vmatpush3.bf16.msra.mxu1 %v837_v10 }
  0x51   :  { %749 = vmatprep.subr.bf16.mxu1 %v1002_v0  ;;  %764 = vmatpush3.bf16.msra.mxu0 %v843_v16  ;;  %v674_v16 = vld [vmem:[%s1122_s5] ss:$0 sm:$0xff] }
  0x52   :  { %765 = vmatprep.subr.bf16.mxu0 %v1002_v0 }
  0x54   :  { %750 = vmatpush3.bf16.msra.mxu1 %v838_v11 }
  0x55   :  { %751 = vmatprep.subr.bf16.mxu1 %v1002_v0  ;;  %766 = vmatpush3.bf16.msra.mxu0 %v844_v17 }
  0x56   :  { %767 = vmatprep.subr.bf16.mxu0 %v1002_v0 }
  0x58   :  { %752 = vmatpush3.bf16.msra.mxu1 %v839_v12 }
  0x59   :  { %753 = vmatprep.subr.bf16.mxu1 %v1002_v0  ;;  %768 = vmatpush3.bf16.msra.mxu0 %v845_v18 }
  0x5a   :  { %769 = vmatprep.subr.bf16.mxu0 %v1002_v0 }
  0x5c   :  { %754 = vmatpush3.bf16.msra.mxu1 %v840_v13 }
  0x5d   :  { %779 = vmatprep.subr.bf16.mxu1 %v1002_v0  ;;  %770 = vmatpush3.bf16.msra.mxu0 %v846_v29 }
  0x5e   :  { %771 = vmatprep.subr.bf16.mxu0 %v1002_v0 }
  0x61   :  { %772 = vmatpush3.bf16.msra.mxu0 %v847_v30 }
  0x62   :  { %773 = vmatprep.subr.bf16.mxu0 %v1002_v0 }
  0x65   :  { %774 = vmatpush3.bf16.msra.mxu0 %v848_v31 }
  0x66   :  { %799 = vmatprep.subr.bf16.mxu0 %v1002_v0 }
 0x107   :  { %v153_v20 = vpop.f32.mrf.mxu0 }
 0x108   :  { %v154_v22 = vadd.f32 %v643_v19, %v153_v20 }
 0x109   :  { %v737_v21 = vpop.f32.mrf.mxu0 }
 0x10a   :  { %v160_v26 = vmax.f32 %v154_v22, 0.0 }
 0x10b   :  { %v156_v23 = vpop.f32.mrf.mxu0 }
 0x10c   :  { %v157_v24 = vadd.f32 %v643_v19, %v156_v23 }
 0x10d   :  { %v738_v25 = vpop.f32.mrf.mxu0 }
 0x10e   :  { %v161_v27 = vmax.f32 %v157_v24, 0.0 }
 0x110   :  { %v179_v28 = vpack.c.bf16 %v161_v27, %v160_v26 }
 0x112   :  { %756 = vmatmul.mubr.bf16.vlgmr.msra.gmra.mxu1 %v179_v28 }
 0x113   :  { %795 = vmatprep.mubr.msk.bf16.mxu1 %vm1003_vm0, %v1002_v0  ;;  %780 = vmatpush3.bf16.msra.mxu1 %v849_v32 }
 0x114   :  { %781 = vmatprep.subr.bf16.mxu1 %v1002_v0 }
 0x117   :  { %782 = vmatpush3.bf16.msra.mxu1 %v850_v33 }
 0x118   :  { %783 = vmatprep.subr.bf16.mxu1 %v1002_v0 }
 0x11b   :  { %784 = vmatpush3.bf16.msra.mxu1 %v851_v34 }
 0x11c   :  { %785 = vmatprep.subr.bf16.mxu1 %v1002_v0 }
 0x11f   :  { %786 = vmatpush3.bf16.msra.mxu1 %v852_v35 }
 0x120   :  { %787 = vmatprep.subr.bf16.mxu1 %v1002_v0 }
 0x123   :  { %788 = vmatpush3.bf16.msra.mxu1 %v853_v36 }
 0x124   :  { %789 = vmatprep.subr.bf16.mxu1 %v1002_v0 }
 0x127   :  { %790 = vmatpush3.bf16.msra.mxu1 %v854_v47 }
 0x128   :  { %791 = vmatprep.subr.bf16.mxu1 %v1002_v0 }
 0x12b   :  { %792 = vmatpush3.bf16.msra.mxu1 %v855_v48 }
 0x12c   :  { %793 = vmatprep.subr.bf16.mxu1 %v1002_v0 }
 0x12f   :  { %794 = vmatpush3.bf16.msra.mxu1 %v856_v49 }
 0x1d2   :  { %v266_v38 = vpop.f32.mrf.mxu1 }
 0x1d3   :  { %v267_v40 = vadd.f32 %v647_v37, %v266_v38 }
 0x1d4   :  { %v757_v39 = vpop.f32.mrf.mxu1 }
 0x1d5   :  { %v273_v44 = vmax.f32 %v267_v40, 0.0 }
 0x1d6   :  { %v269_v41 = vpop.f32.mrf.mxu1 }
 0x1d7   :  { %v270_v42 = vadd.f32 %v647_v37, %v269_v41 }
 0x1d8   :  { %v758_v43 = vpop.f32.mrf.mxu1 }
 0x1d9   :  { %v274_v45 = vmax.f32 %v270_v42, 0.0 }
 0x1db   :  { %v293_v46 = vpack.c.bf16 %v274_v45, %v273_v44 }
 0x1dd   :  { %776 = vmatmul.mubr.bf16.vlgmr.msra.gmra.mxu0 %v293_v46 }
 0x1de   :  { %815 = vmatprep.mubr.msk.bf16.mxu0 %vm1003_vm0, %v1002_v0  ;;  %800 = vmatpush3.bf16.msra.mxu0 %v857_v50 }
 0x1df   :  { %801 = vmatprep.subr.bf16.mxu0 %v1002_v0 }
 0x1e2   :  { %802 = vmatpush3.bf16.msra.mxu0 %v858_v51 }
 0x1e3   :  { %803 = vmatprep.subr.bf16.mxu0 %v1002_v0 }
 0x1e6   :  { %804 = vmatpush3.bf16.msra.mxu0 %v859_v52 }
 0x1e7   :  { %805 = vmatprep.subr.bf16.mxu0 %v1002_v0 }
 0x1ea   :  { %806 = vmatpush3.bf16.msra.mxu0 %v860_v53 }
 0x1eb   :  { %807 = vmatprep.subr.bf16.mxu0 %v1002_v0 }
 0x1ee   :  { %808 = vmatpush3.bf16.msra.mxu0 %v861_v54 }
 0x1ef   :  { %809 = vmatprep.subr.bf16.mxu0 %v1002_v0 }
 0x1f2   :  { %810 = vmatpush3.bf16.msra.mxu0 %v862_v2 }
 0x1f3   :  { %811 = vmatprep.subr.bf16.mxu0 %v1002_v0 }
 0x1f6   :  { %812 = vmatpush3.bf16.msra.mxu0 %v863_v3 }
 0x1f7   :  { %813 = vmatprep.subr.bf16.mxu0 %v1002_v0 }
 0x1fa   :  { %814 = vmatpush3.bf16.msra.mxu0 %v864_v4 }
 0x29d   :  { %v380_v56 = vpop.f32.mrf.mxu0 }
 0x29e   :  { %v381_v58 = vadd.f32 %v656_v55, %v380_v56 }
 0x29f   :  { %v777_v57 = vpop.f32.mrf.mxu0 }
 0x2a0   :  { %v387_v62 = vmax.f32 %v381_v58, 0.0 }
 0x2a1   :  { %v383_v59 = vpop.f32.mrf.mxu0 }
 0x2a2   :  { %v384_v60 = vadd.f32 %v656_v55, %v383_v59 }
 0x2a3   :  { %v778_v61 = vpop.f32.mrf.mxu0 }
 0x2a4   :  { %v388_v63 = vmax.f32 %v384_v60, 0.0 }
 0x2a6   :  { %v407_v1 = vpack.c.bf16 %v388_v63, %v387_v62 }
 0x2a8   :  { %796 = vmatmul.mubr.bf16.vlgmr.msra.gmra.mxu1 %v407_v1 }
 0x368   :  { %v494_v6 = vpop.f32.mrf.mxu1 }
 0x369   :  { %v495_v8 = vadd.f32 %v665_v5, %v494_v6 }
 0x36a   :  { %v797_v7 = vpop.f32.mrf.mxu1 }
 0x36b   :  { %v501_v12 = vmax.f32 %v495_v8, 0.0 }
 0x36c   :  { %v497_v9 = vpop.f32.mrf.mxu1 }
 0x36d   :  { %v498_v10 = vadd.f32 %v665_v5, %v497_v9 }
 0x36e   :  { %v798_v11 = vpop.f32.mrf.mxu1 }
 0x36f   :  { %v502_v13 = vmax.f32 %v498_v10, 0.0 }
 0x371   :  { %v520_v14 = vpack.c.bf16 %v502_v13, %v501_v12 }
 0x373   :  { %816 = vmatmul.mubr.bf16.vlgmr.msra.gmra.mxu0 %v520_v14 }
 0x433   :  { %v607_v15 = vpop.f32.mrf.mxu0 }
 0x434   :  { %v608_v18 = vadd.f32 %v674_v16, %v607_v15 }
 0x435   :  { %v817_v17 = vpop.f32.mrf.mxu0 }
 0x437   :  { %v610_v0 = vpop.f32.mrf.mxu0 }
 0x438   :  { %v611_v19 = vadd.f32 %v674_v16, %v610_v0 }
 0x439   :  { %v818_v20 = vpop.f32.mrf.mxu0 }
 0x43a   :  { %v690_v21 = vpack.c.bf16 %v611_v19, %v608_v18 }
 0x43c   :  { %691 = vst [vmem:[#allocation11] sm:$0xff] %v690_v21  }
 0x43d   :  { %976 = shalt.err (!%p973_p1)
}
 0x43e   :  { %635 = dma.vmem_to_hbm [thread:$0]  %s630_s26, 128, %s1123_s6, [#allocation4], %s994_s24, %s994_s24, %s995_s25  }
 0x43f   :  { %991 = dma.done.wait [#allocation4], 128  }
 0x440   :  { %992 = vsyncadd [#allocation4], 4294967168 }
 0x441   :  { %639 = vsyncpa [#allocation3], 1 }
 0x442   :  { %640 = vsyncpa [#allocation6], 1 }
 0x443   :  { %641 = vsyncpa [#allocation9], 1 }
 0x444   :  { %642 = vsyncpa [#allocation4], 1 }

// kernel: tpu_custom_call.1
= control target key start
LH: loop header
LB: loop body
LE: loop exit
PB: predicated region body
PF: predicated region fallthrough
CT: control target
= control target key end

     0   :  { %11 = vsyncpa [#allocation3], 0  ;;  %s1117_s0 = inlined_call_operand.hbm [shape: f32[16,32], index: 0, kind: input, shape index: {}]   ;;  %s1118_s1 = inlined_call_operand.hbm [shape: bf16[32,128], index: 1, kind: input, shape index: {}]   ;;  %s1119_s2 = inlined_call_operand.hbm [shape: bf16[3,128,128], index: 2, kind: input, shape index: {}]   ;;  %s1120_s3 = inlined_call_operand.hbm [shape: bf16[128,128], index: 3, kind: input, shape index: {}]   ;;  %s1121_s4 = inlined_call_operand.hbm [shape: f32[8,128], index: 4, kind: input, shape index: {}]   ;;  %s1122_s5 = inlined_call_operand.vmem [shape: f32[8,128], index: 5, kind: input, shape index: {}]   ;;  %s1123_s6 = inlined_call_operand.hbm [shape: bf16[16,128], index: 6, kind: output, shape index: {}]  }
   0x1   :  { %12 = vsyncpa [#allocation6], 0 }
   0x2   :  { %13 = vsyncpa [#allocation9], 0 }
   0x3   :  { %14 = vsyncpa [#allocation4], 0  ;;  %s993_s21 = smov [#allocation5]  }
   0x4   :  { %s32_s22 = sshll.u32 %s993_s21, 4  ;;  %s33_s22 = int_to_ptr.vmem [resolvable:$true] %s32_s22 }
   0x5   :  { %s873_s23 = scalar_lea.vmem %s33_s22, 256  ;;  %p878_p1 = scmp.lt.s32.totalorder %s33_s22, %s33_s22 }
   0x6   :  { %p874_p0 = scmp.ne.s32.totalorder %s33_s22, %s873_s23  ;;  %p879_p2 = scmp.lt.s32.totalorder %s873_s23, %s873_s23 }
   0x8   :  { %p880_p3 = por %p879_p2, %p878_p1 }
   0xa   :  { %p881_p4 = pnand %p880_p3, %p874_p0 }
   0xc   :  { %884 = shalt.err (!%p881_p4)
}
   0xd   :  { %s994_s24 = smov 64   ;;  %s995_s25 = smov 4  }
   0xe   :  { %38 = dma.hbm_to_vmem [thread:$0]  %s1118_s1, 256, %s33_s22, [#allocation6], %s994_s24, %s994_s24, %s995_s25  }
   0xf   :  { %s996_s28 = smov [#allocation8]   ;;  %s997_s30 = smov [#allocation2]  }
  0x10   :  { %s56_s29 = sshll.u32 %s996_s28, 4  ;;  %s20_s7 = sshll.u32 %s997_s30, 4  ;;  %s57_s29 = int_to_ptr.vmem [resolvable:$true] %s56_s29  ;;  %s21_s7 = int_to_ptr.vmem [resolvable:$true] %s20_s7 }
  0x11   :  { %s893_s8 = scalar_lea.vmem %s57_s29, 1024  ;;  %p898_p6 = scmp.lt.s32.totalorder %s57_s29, %s57_s29 }
  0x12   :  { %p894_p5 = scmp.ne.s32.totalorder %s57_s29, %s893_s8  ;;  %p899_p7 = scmp.lt.s32.totalorder %s893_s8, %s893_s8 }
  0x14   :  { %p900_p8 = por %p899_p7, %p898_p6 }
  0x16   :  { %p901_p9 = pnand %p900_p8, %p894_p5 }
  0x18   :  { %904 = shalt.err (!%p901_p9)
}
  0x19   :  { %62 = dma.hbm_to_vmem [thread:$0]  %s1120_s3, 1024, %s57_s29, [#allocation9], %s994_s24, %s994_s24, %s995_s25  }
  0x1a   :  { %s913_s1 = scalar_lea.vmem %s21_s7, 256  ;;  %p918_p11 = scmp.lt.s32.totalorder %s21_s7, %s21_s7 }
  0x1b   :  { %p914_p10 = scmp.ne.s32.totalorder %s21_s7, %s913_s1  ;;  %p919_p12 = scmp.lt.s32.totalorder %s913_s1, %s913_s1 }
  0x1d   :  { %p920_p13 = por %p919_p12, %p918_p11 }
  0x1f   :  { %p921_p0 = pnand %p920_p13, %p914_p10 }
  0x21   :  { %924 = shalt.err (!%p921_p0)
}
  0x22   :  { %s998_s11 = smov 128   ;;  %s999_s12 = smov 8  }
  0x23   :  { %26 = dma.hbm_to_vmem [thread:$0]  %s1117_s0, 256, %s21_s7, [#allocation3], %s998_s11, %s998_s11, %s999_s12  }
  0x24   :  { %s1000_s15 = smov [#allocation7]   ;;  %s1001_s17 = smov [#allocation10]  }
  0x25   :  { %s44_s16 = sshll.u32 %s1000_s15, 4  ;;  %s69_s18 = sshll.u32 %s1001_s17, 4  ;;  %s45_s16 = int_to_ptr.vmem [resolvable:$true] %s44_s16  ;;  %s70_s18 = int_to_ptr.vmem [resolvable:$true] %s69_s18 }
  0x26   :  { %s933_s3 = scalar_lea.vmem %s45_s16, 3072  ;;  %p938_p2 = scmp.lt.s32.totalorder %s45_s16, %s45_s16 }
  0x27   :  { %p934_p1 = scmp.ne.s32.totalorder %s45_s16, %s933_s3  ;;  %p939_p3 = scmp.lt.s32.totalorder %s933_s3, %s933_s3 }
  0x29   :  { %p940_p4 = por %p939_p3, %p938_p2 }
  0x2b   :  { %p941_p5 = pnand %p940_p4, %p934_p1 }
  0x2d   :  { %944 = shalt.err (!%p941_p5)
}
  0x2e   :  { %50 = dma.hbm_to_vmem [thread:$0]  %s1119_s2, 3072, %s45_s16, [#allocation6], %s994_s24, %s994_s24, %s995_s25  }
  0x2f   :  { %s953_s0 = scalar_lea.vmem %s70_s18, 128  ;;  %p958_p7 = scmp.lt.s32.totalorder %s70_s18, %s70_s18 }
  0x30   :  { %p954_p6 = scmp.ne.s32.totalorder %s70_s18, %s953_s0  ;;  %p959_p8 = scmp.lt.s32.totalorder %s953_s0, %s953_s0 }
  0x32   :  { %p960_p9 = por %p959_p8, %p958_p7 }
  0x34   :  { %p961_p10 = pnand %p960_p9, %p954_p6 }
  0x36   :  { %964 = shalt.err (!%p961_p10)
}
  0x37   :  { %72 = dma.hbm_to_vmem [thread:$0]  %s1121_s4, 128, %s70_s18, [#allocation9]  }
  0x38   :  { %985 = dma.done.wait [#allocation3], 256  }
  0x39   :  { %986 = vsyncadd [#allocation3], 4294967040 }
  0x3a   :  { %987 = dma.done.wait [#allocation6], 3328  }
  0x3b   :  { %988 = vsyncadd [#allocation6], 4294963968 }
  0x3c   :  { %989 = dma.done.wait [#allocation9], 1152  }
  0x3d   :  { %990 = vsyncadd [#allocation9], 4294966144  ;;  %v1002_v0 = vmov 0.0   ;;  %vm1003_vm0 = vmmov 0   ;;  %v831_v1 = vld [vmem:[#allocation5 + $0x8] sm:$0xff]   ;;  %v832_v2 = vld [vmem:[#allocation5] sm:$0xff]  }
  0x3e   :  { %731 = vmatprep.subr.bf16.mxu0 %v1002_v0  ;;  %735 = vmatprep.mubr.msk.bf16.mxu0 %vm1003_vm0, %v1002_v0  ;;  %v96_v3 = vld [vmem:[#allocation2] sm:$0xff]  ;;  %v97_v4 = vld [vmem:[#allocation2 + $0x8] sm:$0xff]  ;;  %v833_v5 = vld [vmem:[#allocation7 + $0x38] sm:$0xff]   ;;  %vm115_vm1 = vcmask 261120   ;;  %s1004_s23 = smov [#allocation11]  }
  0x3f   :  { %739 = vmatprep.subr.bf16.mxu1 %v1002_v0  ;;  %755 = vmatprep.mubr.msk.bf16.mxu1 %vm1003_vm0, %v1002_v0  ;;  %v98_v6 = vpack.c.bf16 %v97_v4, %v96_v3  ;;  %v834_v7 = vld [vmem:[#allocation7 + $0x30] sm:$0xff]   ;;  %v835_v8 = vld [vmem:[#allocation7 + $0x28] sm:$0xff]   ;;  %v836_v9 = vld [vmem:[#allocation7 + $0x20] sm:$0xff]   ;;  %s629_s26 = sshll.u32 %s1004_s23, 4  ;;  %s630_s26 = int_to_ptr.vmem [resolvable:$true] %s629_s26 }
  0x40   :  { %732 = vmatpush3.bf16.msra.mxu0 %v831_v1  ;;  %740 = vmatpush3.bf16.msra.mxu1 %v833_v5  ;;  %v837_v10 = vld [vmem:[#allocation7 + $0x18] sm:$0xff]   ;;  %v838_v11 = vld [vmem:[#allocation7 + $0x10] sm:$0xff]   ;;  %v839_v12 = vld [vmem:[#allocation7 + $0x8] sm:$0xff]   ;;  %s965_s27 = scalar_lea.vmem %s630_s26, 128  ;;  %p970_p12 = scmp.lt.s32.totalorder %s630_s26, %s630_s26 }
  0x41   :  { %733 = vmatprep.subr.bf16.mxu0 %v1002_v0  ;;  %741 = vmatprep.subr.bf16.mxu1 %v1002_v0  ;;  %v840_v13 = vld [vmem:[#allocation7] sm:$0xff]   ;;  %v841_v14 = vld [vmem:[#allocation7 + $0x78] sm:$0xff]   ;;  %v842_v15 = vld [vmem:[#allocation7 + $0x70] sm:$0xff]   ;;  %p966_p11 = scmp.ne.s32.totalorder %s630_s26, %s965_s27  ;;  %p971_p13 = scmp.lt.s32.totalorder %s965_s27, %s965_s27 }
  0x42   :  { %v843_v16 = vld [vmem:[#allocation7 + $0x68] sm:$0xff]   ;;  %v844_v17 = vld [vmem:[#allocation7 + $0x60] sm:$0xff]   ;;  %v845_v18 = vld [vmem:[#allocation7 + $0x58] sm:$0xff]  }
  0x43   :  { %v643_v19 = vld [vmem:[#allocation10] ss:$0 sm:$0xff]  ;;  %v846_v29 = vld [vmem:[#allocation7 + $0x50] sm:$0xff]   ;;  %v847_v30 = vld [vmem:[#allocation7 + $0x48] sm:$0xff]   ;;  %p972_p0 = por %p971_p13, %p970_p12 }
  0x44   :  { %734 = vmatpush3.bf16.msra.mxu0 %v832_v2  ;;  %742 = vmatpush3.bf16.msra.mxu1 %v834_v7  ;;  %v848_v31 = vld [vmem:[#allocation7 + $0x40] sm:$0xff]   ;;  %v849_v32 = vld [vmem:[#allocation7 + $0xb8] sm:$0xff]   ;;  %v850_v33 = vld [vmem:[#allocation7 + $0xb0] sm:$0xff]  }
  0x45   :  { %759 = vmatprep.subr.bf16.mxu0 %v1002_v0  ;;  %743 = vmatprep.subr.bf16.mxu1 %v1002_v0  ;;  %v851_v34 = vld [vmem:[#allocation7 + $0xa8] sm:$0xff]   ;;  %v852_v35 = vld [vmem:[#allocation7 + $0xa0] sm:$0xff]   ;;  %v853_v36 = vld [vmem:[#allocation7 + $0x98] sm:$0xff]   ;;  %p973_p1 = pnand %p972_p0, %p966_p11 }
  0x46   :  { %v647_v37 = vld [vmem:[#allocation10 + $0x1] ss:$0 sm:$0xff]  ;;  %v854_v47 = vld [vmem:[#allocation7 + $0x90] sm:$0xff]   ;;  %v855_v48 = vld [vmem:[#allocation7 + $0x88] sm:$0xff]  }
  0x47   :  { %736 = vmatmul.mubr.msk.bf16.vlgmr.msra.gmra.mxu0 %vm115_vm1, %v98_v6  ;;  %v856_v49 = vld [vmem:[#allocation7 + $0x80] sm:$0xff]   ;;  %v857_v50 = vld [vmem:[#allocation8 + $0x38] sm:$0xff]   ;;  %v858_v51 = vld [vmem:[#allocation8 + $0x30] sm:$0xff]  }
  0x48   :  { %775 = vmatprep.mubr.msk.bf16.mxu0 %vm1003_vm0, %v1002_v0  ;;  %744 = vmatpush3.bf16.msra.mxu1 %v835_v8  ;;  %v859_v52 = vld [vmem:[#allocation8 + $0x28] sm:$0xff]   ;;  %v860_v53 = vld [vmem:[#allocation8 + $0x20] sm:$0xff]   ;;  %v861_v54 = vld [vmem:[#allocation8 + $0x18] sm:$0xff]  }
  0x49   :  { %745 = vmatprep.subr.bf16.mxu1 %v1002_v0  ;;  %760 = vmatpush3.bf16.msra.mxu0 %v841_v14  ;;  %v656_v55 = vld [vmem:[#allocation10 + $0x2] ss:$0 sm:$0xff]  ;;  %v862_v2 = vld [vmem:[#allocation8 + $0x10] sm:$0xff]   ;;  %v863_v3 = vld [vmem:[#allocation8 + $0x8] sm:$0xff]  }
  0x4a   :  { %761 = vmatprep.subr.bf16.mxu0 %v1002_v0  ;;  %v864_v4 = vld [vmem:[#allocation8] sm:$0xff]  }
  0x4b   :  { %v665_v5 = vld [vmem:[#allocation10 + $0x3] ss:$0 sm:$0xff] }
  0x4c   :  { %746 = vmatpush3.bf16.msra.mxu1 %v836_v9 }
  0x4d   :  { %747 = vmatprep.subr.bf16.mxu1 %v1002_v0  ;;  %762 = vmatpush3.bf16.msra.mxu0 %v842_v15 }
  0x4e   :  { %763 = vmatprep.subr.bf16.mxu0 %v1002_v0 }
  0x50   :  { %748 = vmatpush3.bf16.msra.mxu1 %v837_v10 }
  0x51   :  { %749 = vmatprep.subr.bf16.mxu1 %v1002_v0  ;;  %764 = vmatpush3.bf16.msra.mxu0 %v843_v16  ;;  %v674_v16 = vld [vmem:[%s1122_s5] ss:$0 sm:$0xff] }
  0x52   :  { %765 = vmatprep.subr.bf16.mxu0 %v1002_v0 }
  0x54   :  { %750 = vmatpush3.bf16.msra.mxu1 %v838_v11 }
  0x55   :  { %751 = vmatprep.subr.bf16.mxu1 %v1002_v0  ;;  %766 = vmatpush3.bf16.msra.mxu0 %v844_v17 }
  0x56   :  { %767 = vmatprep.subr.bf16.mxu0 %v1002_v0 }
  0x58   :  { %752 = vmatpush3.bf16.msra.mxu1 %v839_v12 }
  0x59   :  { %753 = vmatprep.subr.bf16.mxu1 %v1002_v0  ;;  %768 = vmatpush3.bf16.msra.mxu0 %v845_v18 }
  0x5a   :  { %769 = vmatprep.subr.bf16.mxu0 %v1002_v0 }
  0x5c   :  { %754 = vmatpush3.bf16.msra.mxu1 %v840_v13 }
  0x5d   :  { %779 = vmatprep.subr.bf16.mxu1 %v1002_v0  ;;  %770 = vmatpush3.bf16.msra.mxu0 %v846_v29 }
  0x5e   :  { %771 = vmatprep.subr.bf16.mxu0 %v1002_v0 }
  0x61   :  { %772 = vmatpush3.bf16.msra.mxu0 %v847_v30 }
  0x62   :  { %773 = vmatprep.subr.bf16.mxu0 %v1002_v0 }
  0x65   :  { %774 = vmatpush3.bf16.msra.mxu0 %v848_v31 }
  0x66   :  { %799 = vmatprep.subr.bf16.mxu0 %v1002_v0 }
 0x107   :  { %v153_v20 = vpop.f32.mrf.mxu0 }
 0x108   :  { %v154_v22 = vadd.f32 %v643_v19, %v153_v20 }
 0x109   :  { %v737_v21 = vpop.f32.mrf.mxu0 }
 0x10a   :  { %v160_v26 = vmax.f32 %v154_v22, 0.0 }
 0x10b   :  { %v156_v23 = vpop.f32.mrf.mxu0 }
 0x10c   :  { %v157_v24 = vadd.f32 %v643_v19, %v156_v23 }
 0x10d   :  { %v738_v25 = vpop.f32.mrf.mxu0 }
 0x10e   :  { %v161_v27 = vmax.f32 %v157_v24, 0.0 }
 0x110   :  { %v179_v28 = vpack.c.bf16 %v161_v27, %v160_v26 }
 0x112   :  { %756 = vmatmul.mubr.bf16.vlgmr.msra.gmra.mxu1 %v179_v28 }
 0x113   :  { %795 = vmatprep.mubr.msk.bf16.mxu1 %vm1003_vm0, %v1002_v0  ;;  %780 = vmatpush3.bf16.msra.mxu1 %v849_v32 }
 0x114   :  { %781 = vmatprep.subr.bf16.mxu1 %v1002_v0 }
 0x117   :  { %782 = vmatpush3.bf16.msra.mxu1 %v850_v33 }
 0x118   :  { %783 = vmatprep.subr.bf16.mxu1 %v1002_v0 }
 0x11b   :  { %784 = vmatpush3.bf16.msra.mxu1 %v851_v34 }
 0x11c   :  { %785 = vmatprep.subr.bf16.mxu1 %v1002_v0 }
 0x11f   :  { %786 = vmatpush3.bf16.msra.mxu1 %v852_v35 }
 0x120   :  { %787 = vmatprep.subr.bf16.mxu1 %v1002_v0 }
 0x123   :  { %788 = vmatpush3.bf16.msra.mxu1 %v853_v36 }
 0x124   :  { %789 = vmatprep.subr.bf16.mxu1 %v1002_v0 }
 0x127   :  { %790 = vmatpush3.bf16.msra.mxu1 %v854_v47 }
 0x128   :  { %791 = vmatprep.subr.bf16.mxu1 %v1002_v0 }
 0x12b   :  { %792 = vmatpush3.bf16.msra.mxu1 %v855_v48 }
 0x12c   :  { %793 = vmatprep.subr.bf16.mxu1 %v1002_v0 }
 0x12f   :  { %794 = vmatpush3.bf16.msra.mxu1 %v856_v49 }
 0x1d2   :  { %v266_v38 = vpop.f32.mrf.mxu1 }
 0x1d3   :  { %v267_v40 = vadd.f32 %v647_v37, %v266_v38 }
 0x1d4   :  { %v757_v39 = vpop.f32.mrf.mxu1 }
 0x1d5   :  { %v273_v44 = vmax.f32 %v267_v40, 0.0 }
 0x1d6   :  { %v269_v41 = vpop.f32.mrf.mxu1 }
 0x1d7   :  { %v270_v42 = vadd.f32 %v647_v37, %v269_v41 }
 0x1d8   :  { %v758_v43 = vpop.f32.mrf.mxu1 }
 0x1d9   :  { %v274_v45 = vmax.f32 %v270_v42, 0.0 }
 0x1db   :  { %v293_v46 = vpack.c.bf16 %v274_v45, %v273_v44 }
 0x1dd   :  { %776 = vmatmul.mubr.bf16.vlgmr.msra.gmra.mxu0 %v293_v46 }
 0x1de   :  { %815 = vmatprep.mubr.msk.bf16.mxu0 %vm1003_vm0, %v1002_v0  ;;  %800 = vmatpush3.bf16.msra.mxu0 %v857_v50 }
 0x1df   :  { %801 = vmatprep.subr.bf16.mxu0 %v1002_v0 }
 0x1e2   :  { %802 = vmatpush3.bf16.msra.mxu0 %v858_v51 }
 0x1e3   :  { %803 = vmatprep.subr.bf16.mxu0 %v1002_v0 }
 0x1e6   :  { %804 = vmatpush3.bf16.msra.mxu0 %v859_v52 }
 0x1e7   :  { %805 = vmatprep.subr.bf16.mxu0 %v1002_v0 }
 0x1ea   :  { %806 = vmatpush3.bf16.msra.mxu0 %v860_v53 }
 0x1eb   :  { %807 = vmatprep.subr.bf16.mxu0 %v1002_v0 }
 0x1ee   :  { %808 = vmatpush3.bf16.msra.mxu0 %v861_v54 }
 0x1ef   :  { %809 = vmatprep.subr.bf16.mxu0 %v1002_v0 }
 0x1f2   :  { %810 = vmatpush3.bf16.msra.mxu0 %v862_v2 }
 0x1f3   :  { %811 = vmatprep.subr.bf16.mxu0 %v1002_v0 }
 0x1f6   :  { %812 = vmatpush3.bf16.msra.mxu0 %v863_v3 }
 0x1f7   :  { %813 = vmatprep.subr.bf16.mxu0 %v1002_v0 }
 0x1fa   :  { %814 = vmatpush3.bf16.msra.mxu0 %v864_v4 }
 0x29d   :  { %v380_v56 = vpop.f32.mrf.mxu0 }
 0x29e   :  { %v381_v58 = vadd.f32 %v656_v55, %v380_v56 }
 0x29f   :  { %v777_v57 = vpop.f32.mrf.mxu0 }
 0x2a0   :  { %v387_v62 = vmax.f32 %v381_v58, 0.0 }
 0x2a1   :  { %v383_v59 = vpop.f32.mrf.mxu0 }
 0x2a2   :  { %v384_v60 = vadd.f32 %v656_v55, %v383_v59 }
 0x2a3   :  { %v778_v61 = vpop.f32.mrf.mxu0 }
 0x2a4   :  { %v388_v63 = vmax.f32 %v384_v60, 0.0 }
 0x2a6   :  { %v407_v1 = vpack.c.bf16 %v388_v63, %v387_v62 }
 0x2a8   :  { %796 = vmatmul.mubr.bf16.vlgmr.msra.gmra.mxu1 %v407_v1 }
 0x368   :  { %v494_v6 = vpop.f32.mrf.mxu1 }
 0x369   :  { %v495_v8 = vadd.f32 %v665_v5, %v494_v6 }
 0x36a   :  { %v797_v7 = vpop.f32.mrf.mxu1 }
 0x36b   :  { %v501_v12 = vmax.f32 %v495_v8, 0.0 }
 0x36c   :  { %v497_v9 = vpop.f32.mrf.mxu1 }
 0x36d   :  { %v498_v10 = vadd.f32 %v665_v5, %v497_v9 }
 0x36e   :  { %v798_v11 = vpop.f32.mrf.mxu1 }
 0x36f   :  { %v502_v13 = vmax.f32 %v498_v10, 0.0 }
 0x371   :  { %v520_v14 = vpack.c.bf16 %v502_v13, %v501_v12 }
 0x373   :  { %816 = vmatmul.mubr.bf16.vlgmr.msra.gmra.mxu0 %v520_v14 }
 0x433   :  { %v607_v15 = vpop.f32.mrf.mxu0 }
 0x434   :  { %v608_v18 = vadd.f32 %v674_v16, %v607_v15 }
 0x435   :  { %v817_v17 = vpop.f32.mrf.mxu0 }
 0x437   :  { %v610_v0 = vpop.f32.mrf.mxu0 }
 0x438   :  { %v611_v19 = vadd.f32 %v674_v16, %v610_v0 }
 0x439   :  { %v818_v20 = vpop.f32.mrf.mxu0 }
 0x43a   :  { %v690_v21 = vpack.c.bf16 %v611_v19, %v608_v18 }
 0x43c   :  { %691 = vst [vmem:[#allocation11] sm:$0xff] %v690_v21  }
 0x43d   :  { %976 = shalt.err (!%p973_p1)
}
 0x43e   :  { %635 = dma.vmem_to_hbm [thread:$0]  %s630_s26, 128, %s1123_s6, [#allocation4], %s994_s24, %s994_s24, %s995_s25  }
 0x43f   :  { %991 = dma.done.wait [#allocation4], 128  }
 0x440   :  { %992 = vsyncadd [#allocation4], 4294967168 }
 0x441   :  { %639 = vsyncpa [#allocation3], 1 }
 0x442   :  { %640 = vsyncpa [#allocation6], 1 }
 0x443   :  { %641 = vsyncpa [#allocation9], 1 }
 0x444   :  { %642 = vsyncpa [#allocation4], 1 }

</bundles_post_ra>
